<compile_context>
chip_gen: v7x
topology: tpu7x:2x2x1
jax: 0.10.0
libtpu: 0.0.40
codegen_flags: <defaults>
</compile_context>

<pallas_src>
import functools

import jax
import jax.numpy as jnp
from jax.experimental import pallas as pl
from jax.experimental.pallas import tpu as pltpu


def _sigmoid(h):
    # exp and the *approximate* reciprocal both go to the EUP slot; avoids the
    # full-precision divide's VPU Newton refinement.  Relies on moderate
    # pre-activation magnitudes (|h| <~ 10 for this net); jax.nn.sigmoid is the
    # numerically-hardened fallback if inputs could be huge.
    return pl.reciprocal(1.0 + jnp.exp(-h), approx=True)


def ournet_kernel(x_ref, w1_ref, b1_ref, w2_ref, b2_ref, w3_ref, b3_ref, o_ref,
                  *, mxu_bf16):
    """One batch tile of the MLP, batch on the lane (last) axis.

    Kernel-side shapes (H = hidden, TB = batch tile):
      x_ref : (1, TB)
      w1,b1 : (H, 1), (H, 1)
      w2,b2 : (H, H), (H, 1)
      w3,b3 : (H, 1), (1, 1)
      o_ref : (1, TB)
    """
    xT = x_ref[...]                                              # (1, TB)

    # fc1 (K=1): VPU broadcast outer product, skip the MXU entirely.
    h1 = _sigmoid(w1_ref[...] * xT + b1_ref[...])                # (H, TB) f32

    # fc2 (H x H): the only real matmul -> MXU with f32 accumulation.
    if mxu_bf16:
        # v6e/v7x option: native bf16 MXU passes instead of multi-pass f32
        # emulation.  Off by default (accuracy vs. negligible speedup at H=32).
        h2 = jnp.dot(w2_ref[...].astype(jnp.bfloat16),
                     h1.astype(jnp.bfloat16),
                     preferred_element_type=jnp.float32)
    else:
        h2 = jnp.dot(w2_ref[...], h1, preferred_element_type=jnp.float32)
    h2 = _sigmoid(h2 + b2_ref[...])                              # (H, TB) f32

    # fc3 (out features = 1): VPU multiply + cross-sublane (XLU) reduce,
    # avoids a masked single-lane MXU result.
    out = jnp.sum(w3_ref[...] * h2, axis=0, keepdims=True) + b3_ref[...]
    o_ref[...] = out.astype(o_ref.dtype)                         # (1, TB)


def _round_up(x, m):
    return ((x + m - 1) // m) * m


def _choose_tiling(batch, tile_b_max):
    """Pick (padded batch, batch tile, grid steps).

    Pads only to the 128-lane width (plus a small residual from the grid
    split), maximizes the tile up to tile_b_max, and forces >= 2 (even) grid
    steps when there is enough work so the "parallel" axis can shard across
    v7x's two TensorCores.
    """
    LANE = 128
    bp = _round_up(batch, LANE)
    n_steps = max(1, -(-bp // tile_b_max))      # ceil(bp / tile_b_max)
    if bp >= 2 * LANE:
        n_steps = max(n_steps, 2)               # give the 2nd TC work on v7x
    if n_steps > 1 and n_steps % 2:
        n_steps += 1                            # even split across 2 TCs
    tile_b = _round_up(-(-bp // n_steps), LANE)  # lane-dense tile
    bp = tile_b * n_steps                        # residual pad < 128 per step
    return bp, tile_b, n_steps


def ournet_forward(x, params, *, tile_b_max=4096, mxu_bf16=False):
    """x: (B, 1) float32 -> (B, 1) float32.

    tile_b_max: per-step batch tile cap.  VMEM live set per step is roughly
    (8*H + 16) * tile_b bytes (~272 B/elem at H=32) -> ~1.1 MiB at 4096, far
    below the 32 MiB default scoped VMEM on v5e/v6e/v7x.  Sweep 2048-8192.
    """
    w1, b1, w2, b2, w3, b3 = params
    B = x.shape[0]
    H = w1.shape[0]

    Bp, tile_b, n_steps = _choose_tiling(B, tile_b_max)

    # Batch on the lane axis; pad only to the (lane-multiple) chosen tiling.
    xT = jnp.zeros((1, Bp), x.dtype).at[:, :B].set(x.T)

    def weight_spec(shape):
        # Full-array block, constant index_map -> stays resident in VMEM; the
        # TPU pipeline does not re-DMA blocks whose index is unchanged, so
        # extra buffering control (pl.Buffered(1)) is unnecessary here.
        return pl.BlockSpec(shape, lambda i: (0, 0))

    kernel = functools.partial(ournet_kernel, mxu_bf16=mxu_bf16)

    outT = pl.pallas_call(
        kernel,
        out_shape=jax.ShapeDtypeStruct((1, Bp), jnp.float32),
        grid=(n_steps,),
        in_specs=[
            pl.BlockSpec((1, tile_b), lambda i: (0, i)),  # x batch tile
            weight_spec((H, 1)),                          # w1
            weight_spec((H, 1)),                          # b1
            weight_spec((H, H)),                          # w2
            weight_spec((H, 1)),                          # b2
            weight_spec((H, 1)),                          # w3
            weight_spec((1, 1)),                          # b3
        ],
        out_specs=pl.BlockSpec((1, tile_b), lambda i: (0, i)),
        compiler_params=pltpu.CompilerParams(
            dimension_semantics=("parallel",),
        ),
    )(xT, w1, b1, w2, b2, w3, b3)

    return outT[:, :B].T


def init_params(key, n_hid_n):
    """Deterministic init mimicking nn.Linear (uniform(-1/sqrt(fan_in), ...)),
    stored in the (features, batch) kernel orientation."""

    def linear(k, fan_in, fan_out):
        kw, kb = jax.random.split(k)
        bound = 1.0 / jnp.sqrt(jnp.float32(fan_in))
        w = jax.random.uniform(kw, (fan_out, fan_in), jnp.float32, -bound, bound)
        b = jax.random.uniform(kb, (fan_out, 1), jnp.float32, -bound, bound)
        return w, b

    k1, k2, k3 = jax.random.split(key, 3)
    w1, b1 = linear(k1, 1, n_hid_n)          # (H, 1), (H, 1)
    w2, b2 = linear(k2, n_hid_n, n_hid_n)    # (H, H), (H, 1)
    w3t, b3 = linear(k3, n_hid_n, 1)         # (1, H), (1, 1)
    w3 = w3t.T                               # (H, 1) for the VPU+reduce fc3
    return w1, b1, w2, b2, w3, b3


def ournet_reference(x, params):
    w1, b1, w2, b2, w3, b3 = params
    h = jax.nn.sigmoid(x @ w1.T + b1.T)
    h = jax.nn.sigmoid(h @ w2.T + b2.T)
    return h @ w3 + b3.T


if __name__ == "__main__":
    key = jax.random.PRNGKey(0)
    k_params, k_x, k_x2 = jax.random.split(key, 3)

    n_hid_n = 32
    params = init_params(k_params, n_hid_n)

    # Tolerance loosened from 1e-5: the in-kernel sigmoid uses the EUP
    # approximate reciprocal (perf-review item), costing a few 1e-4..1e-3 of
    # absolute accuracy after two layers.
    ATOL = RTOL = 1e-2

    # Case 1: the module's toy size (single grid step, ragged tail masked off).
    batch = 8
    x = jax.random.normal(k_x, (batch, 1), jnp.float32)
    out = jax.block_until_ready(ournet_forward(x, params))
    ref = ournet_reference(x, params)
    assert out.shape == (batch, 1)
    assert jnp.allclose(out, ref, atol=ATOL, rtol=RTOL), \
        float(jnp.max(jnp.abs(out - ref)))

    # Case 2: exercises the multi-step (2-tile) grid path used for v7x sharding.
    batch2 = 300
    x2 = jax.random.normal(k_x2, (batch2, 1), jnp.float32)
    out2 = jax.block_until_ready(ournet_forward(x2, params))
    ref2 = ournet_reference(x2, params)
    assert out2.shape == (batch2, 1)
    assert jnp.allclose(out2, ref2, atol=ATOL, rtol=RTOL), \
        float(jnp.max(jnp.abs(out2 - ref2)))

    print("KERNEL_OK")
</pallas_src>

<mosaic_0001>
module attributes {stable_mosaic.version = 11 : i64} {
  func.func @ournet_kernel(%arg0: i32, %arg1: memref<1x128xf32, #tpu.memory_space<vmem>>, %arg2: memref<32x1xf32, #tpu.memory_space<vmem>>, %arg3: memref<32x1xf32, #tpu.memory_space<vmem>>, %arg4: memref<32x32xf32, #tpu.memory_space<vmem>>, %arg5: memref<32x1xf32, #tpu.memory_space<vmem>>, %arg6: memref<32x1xf32, #tpu.memory_space<vmem>>, %arg7: memref<1x1xf32, #tpu.memory_space<vmem>>, %arg8: memref<1x128xf32, #tpu.memory_space<vmem>>) attributes {dimension_semantics = [#tpu.dimension_semantics<parallel>], iteration_bounds = array<i64: 1>, scalar_prefetch = 0 : i64, scratch_operands = 0 : i64, tpu.core_type = #tpu.core_type<tc>, window_params = [{transform_indices = @transform_0, window_bounds = array<i64: 1, 128>}, {pipeline_mode = #tpu.pipeline_mode<synchronous>, transform_indices = @transform_1, window_bounds = array<i64: 32, 1>}, {pipeline_mode = #tpu.pipeline_mode<synchronous>, transform_indices = @transform_2, window_bounds = array<i64: 32, 1>}, {pipeline_mode = #tpu.pipeline_mode<synchronous>, transform_indices = @transform_3, window_bounds = array<i64: 32, 32>}, {pipeline_mode = #tpu.pipeline_mode<synchronous>, transform_indices = @transform_4, window_bounds = array<i64: 32, 1>}, {pipeline_mode = #tpu.pipeline_mode<synchronous>, transform_indices = @transform_5, window_bounds = array<i64: 32, 1>}, {pipeline_mode = #tpu.pipeline_mode<synchronous>, transform_indices = @transform_6, window_bounds = array<i64: 1, 1>}, {transform_indices = @transform_7, window_bounds = array<i64: 1, 128>}]} {
    %c0 = arith.constant 0 : index
    %c0_0 = arith.constant 0 : index
    %0 = vector.load %arg1[%c0, %c0_0] : memref<1x128xf32, #tpu.memory_space<vmem>>, vector<1x128xf32>
    %c0_1 = arith.constant 0 : index
    %c0_2 = arith.constant 0 : index
    %1 = vector.load %arg2[%c0_1, %c0_2] : memref<32x1xf32, #tpu.memory_space<vmem>>, vector<32x1xf32>
    %2 = vector.broadcast %1 : vector<32x1xf32> to vector<32x128xf32>
    %3 = vector.broadcast %0 : vector<1x128xf32> to vector<32x128xf32>
    %4 = arith.mulf %2, %3 : vector<32x128xf32>
    %c0_3 = arith.constant 0 : index
    %c0_4 = arith.constant 0 : index
    %5 = vector.load %arg3[%c0_3, %c0_4] : memref<32x1xf32, #tpu.memory_space<vmem>>, vector<32x1xf32>
    %6 = vector.broadcast %5 : vector<32x1xf32> to vector<32x128xf32>
    %7 = arith.addf %4, %6 : vector<32x128xf32>
    %cst = arith.constant 0.000000e+00 : f32
    %8 = vector.broadcast %cst : f32 to vector<32x128xf32>
    %9 = arith.subf %8, %7 : vector<32x128xf32>
    %10 = math.exp %9 : vector<32x128xf32>
    %cst_5 = arith.constant 1.000000e+00 : f32
    %11 = vector.broadcast %cst_5 : f32 to vector<32x128xf32>
    %12 = arith.addf %11, %10 : vector<32x128xf32>
    %13 = tpu.reciprocal %12 {approx = true} : vector<32x128xf32> -> vector<32x128xf32>
    %c0_6 = arith.constant 0 : index
    %c0_7 = arith.constant 0 : index
    %14 = vector.load %arg4[%c0_6, %c0_7] : memref<32x32xf32, #tpu.memory_space<vmem>>, vector<32x32xf32>
    %cst_8 = arith.constant dense<0.000000e+00> : vector<32x128xf32>
    %15 = tpu.matmul %14, %13, %cst_8 {dimension_numbers = #tpu.dot_dimension_numbers<[1], [0], [0], [1], [0, 0, 1, 1], [], []>} : vector<32x32xf32>, vector<32x128xf32>, vector<32x128xf32> -> vector<32x128xf32>
    %c0_9 = arith.constant 0 : index
    %c0_10 = arith.constant 0 : index
    %16 = vector.load %arg5[%c0_9, %c0_10] : memref<32x1xf32, #tpu.memory_space<vmem>>, vector<32x1xf32>
    %17 = vector.broadcast %16 : vector<32x1xf32> to vector<32x128xf32>
    %18 = arith.addf %15, %17 : vector<32x128xf32>
    %cst_11 = arith.constant 0.000000e+00 : f32
    %19 = vector.broadcast %cst_11 : f32 to vector<32x128xf32>
    %20 = arith.subf %19, %18 : vector<32x128xf32>
    %21 = math.exp %20 : vector<32x128xf32>
    %cst_12 = arith.constant 1.000000e+00 : f32
    %22 = vector.broadcast %cst_12 : f32 to vector<32x128xf32>
    %23 = arith.addf %22, %21 : vector<32x128xf32>
    %24 = tpu.reciprocal %23 {approx = true} : vector<32x128xf32> -> vector<32x128xf32>
    %c0_13 = arith.constant 0 : index
    %c0_14 = arith.constant 0 : index
    %25 = vector.load %arg6[%c0_13, %c0_14] : memref<32x1xf32, #tpu.memory_space<vmem>>, vector<32x1xf32>
    %26 = vector.broadcast %25 : vector<32x1xf32> to vector<32x128xf32>
    %27 = arith.mulf %26, %24 : vector<32x128xf32>
    %cst_15 = arith.constant dense<0.000000e+00> : vector<128xf32>
    %28 = vector.multi_reduction <add>, %27, %cst_15 [0] : vector<32x128xf32> to vector<128xf32>
    %29 = vector.shape_cast %28 : vector<128xf32> to vector<1x128xf32>
    %c0_16 = arith.constant 0 : index
    %c0_17 = arith.constant 0 : index
    %30 = vector.load %arg7[%c0_16, %c0_17] : memref<1x1xf32, #tpu.memory_space<vmem>>, vector<1x1xf32>
    %31 = vector.broadcast %30 : vector<1x1xf32> to vector<1x128xf32>
    %32 = arith.addf %29, %31 : vector<1x128xf32>
    %c0_18 = arith.constant 0 : index
    %c0_19 = arith.constant 0 : index
    %33 = vector.load %arg8[%c0_18, %c0_19] : memref<1x128xf32, #tpu.memory_space<vmem>>, vector<1x128xf32>
    tpu.vector_store %arg8[%c0_18, %c0_19], %32 {strides = array<i32>} : memref<1x128xf32, #tpu.memory_space<vmem>>, vector<1x128xf32>,
    return
  }
  func.func @transform_0(%arg0: i32) -> (i32, i32) {
    %c0_i32 = arith.constant 0 : i32
    %c0_i32_0 = arith.constant 0 : i32
    return %c0_i32, %arg0 : i32, i32
  }
  func.func @transform_1(%arg0: i32) -> (i32, i32) {
    %c0_i32 = arith.constant 0 : i32
    %c0_i32_0 = arith.constant 0 : i32
    %c0_i32_1 = arith.constant 0 : i32
    return %c0_i32, %c0_i32_0 : i32, i32
  }
  func.func @transform_2(%arg0: i32) -> (i32, i32) {
    %c0_i32 = arith.constant 0 : i32
    %c0_i32_0 = arith.constant 0 : i32
    %c0_i32_1 = arith.constant 0 : i32
    return %c0_i32, %c0_i32_0 : i32, i32
  }
  func.func @transform_3(%arg0: i32) -> (i32, i32) {
    %c0_i32 = arith.constant 0 : i32
    %c0_i32_0 = arith.constant 0 : i32
    %c0_i32_1 = arith.constant 0 : i32
    return %c0_i32, %c0_i32_0 : i32, i32
  }
  func.func @transform_4(%arg0: i32) -> (i32, i32) {
    %c0_i32 = arith.constant 0 : i32
    %c0_i32_0 = arith.constant 0 : i32
    %c0_i32_1 = arith.constant 0 : i32
    return %c0_i32, %c0_i32_0 : i32, i32
  }
  func.func @transform_5(%arg0: i32) -> (i32, i32) {
    %c0_i32 = arith.constant 0 : i32
    %c0_i32_0 = arith.constant 0 : i32
    %c0_i32_1 = arith.constant 0 : i32
    return %c0_i32, %c0_i32_0 : i32, i32
  }
  func.func @transform_6(%arg0: i32) -> (i32, i32) {
    %c0_i32 = arith.constant 0 : i32
    %c0_i32_0 = arith.constant 0 : i32
    %c0_i32_1 = arith.constant 0 : i32
    return %c0_i32, %c0_i32_0 : i32, i32
  }
  func.func @transform_7(%arg0: i32) -> (i32, i32) {
    %c0_i32 = arith.constant 0 : i32
    %c0_i32_0 = arith.constant 0 : i32
    return %c0_i32, %arg0 : i32, i32
  }
}

</mosaic_0001>

<bundles_post_ra>
// kernel: tpu_custom_call.1
= control target key start
LH: loop header
LB: loop body
LE: loop exit
PB: predicated region body
PF: predicated region fallthrough
CT: control target
= control target key end

     0   :  { %s544_s0 = inlined_call_operand.vmem [shape: f32[1,128], index: 0, kind: input, shape index: {}]   ;;  %s545_s1 = inlined_call_operand.vmem [shape: f32[32,1], index: 1, kind: input, shape index: {}]   ;;  %s546_s2 = inlined_call_operand.vmem [shape: f32[32,1], index: 2, kind: input, shape index: {}]   ;;  %s547_s3 = inlined_call_operand.vmem [shape: f32[32,32], index: 3, kind: input, shape index: {}]   ;;  %s548_s4 = inlined_call_operand.vmem [shape: f32[32,1], index: 4, kind: input, shape index: {}]   ;;  %s549_s5 = inlined_call_operand.vmem [shape: f32[32,1], index: 5, kind: input, shape index: {}]   ;;  %s550_s6 = inlined_call_operand.<no memory space> [shape: f32[1,1], index: 6, kind: input, shape index: {}]   ;;  %s551_s7 = inlined_call_operand.hbm [shape: f32[1,128], index: 7, kind: output, shape index: {}]  }
   0x1   :  { %v12_v0 = vstv %s550_s6 }
   0x2   :  { %13 = vst [vmem:[#allocation2] sm:$0x1] %v12_v0 }
   0x3   :  { %v64_v1 = vld [vmem:[%s546_s2] sm:$0xff]  ;;  %v420_v3 = vmov 0   ;;  %v65_v4 = vld [vmem:[%s546_s2 + $0x8] sm:$0xff] }
   0x4   :  { %v30_v2 = vld [vmem:[%s545_s1] sm:$0xff]  ;;  %363 = vset.pattern.permute.xlu1 %v420_v3  ;;  %362 = vset.pattern.permute.xlu0 %v420_v3  ;;  %v31_v5 = vld [vmem:[%s545_s1 + $0x8] sm:$0xff] }
   0x5   :  { %70 = vperm.xlu1 %363, %v64_v1   ;;  %36 = vperm.xlu0 %362, %v30_v2  }
   0x9   :  { %75 = vperm.xlu1 %363, %v65_v4   ;;  %41 = vperm.xlu0 %362, %v31_v5  }
   0xa   :  { %14 = vsyncpa [#allocation4], 0  ;;  %v33_v6 = vld [vmem:[%s545_s1 + $0x18] sm:$0xff]  ;;  %v32_v7 = vld [vmem:[%s545_s1 + $0x10] sm:$0xff]  ;;  %vm140_vm0 = vcmask 261120  }
   0xb   :  { %v67_v8 = vld [vmem:[%s546_s2 + $0x18] sm:$0xff]  ;;  %v66_v9 = vld [vmem:[%s546_s2 + $0x10] sm:$0xff]  ;;  %v117_v10 = vld [vmem:[%s548_s4 + $0x8] sm:$0xff] }
   0xc   :  { %v116_v11 = vld [vmem:[%s548_s4] sm:$0xff]  ;;  %v119_v12 = vld [vmem:[%s548_s4 + $0x18] sm:$0xff]  ;;  %v118_v13 = vld [vmem:[%s548_s4 + $0x10] sm:$0xff] }
   0xd   :  { %51 = vperm.xlu1 %363, %v33_v6   ;;  %46 = vperm.xlu0 %362, %v32_v7   ;;  %v259_v14 = vld [vmem:[%s549_s5 + $0x8] sm:$0xff]  ;;  %v258_v15 = vld [vmem:[%s549_s5] sm:$0xff]  ;;  %v261_v16 = vld [vmem:[%s549_s5 + $0x18] sm:$0xff] }
   0xe   :  { %v260_v17 = vld [vmem:[%s549_s5 + $0x10] sm:$0xff]  ;;  %v295_v18 = vld [vmem:[#allocation2] sm:$0x1]  ;;  %v113_v60 = vld [vmem:[%s547_s3 + $0x8] sm:$0xff] }
   0xf   :  { %v112_v19 = vld [vmem:[%s547_s3] sm:$0xff]  ;;  %v114_v20 = vld [vmem:[%s547_s3 + $0x10] sm:$0xff]  ;;  %v115_v61 = vld [vmem:[%s547_s3 + $0x18] sm:$0xff]  ;;  %s421_s3 = smov [#allocation3]  }
  0x10   :  { %342 = vmatprep.mubr.msk.f32.mxu0 %vm140_vm0, %v112_v19  ;;  %345 = vmatprep.mubr.msk.f32.mxu1 %vm140_vm0, %v114_v20  ;;  %v321_v21 = vld [vmem:[%s544_s0] ss:$0 sm:$0xff]  ;;  %s313_s15 = sshll.u32 %s421_s3, 4  ;;  %s314_s15 = int_to_ptr.vmem [resolvable:$true] %s313_s15 }
  0x11   :  { %85 = vperm.xlu1 %363, %v67_v8   ;;  %80 = vperm.xlu0 %362, %v66_v9   ;;  %s396_s16 = scalar_lea.vmem %s314_s15, 16  ;;  %s400_s17 = scalar_lea.vmem %s314_s15, 32 }
  0x12   :  { %p397_p0 = scmp.ne.s32.totalorder %s314_s15, %s396_s16  ;;  %p401_p1 = scmp.lt.s32.totalorder %s314_s15, %s314_s15 }
  0x13   :  { %p402_p2 = scmp.lt.s32.totalorder %s400_s17, %s396_s16 }
  0x15   :  { %127 = vperm.xlu1 %363, %v117_v10   ;;  %122 = vperm.xlu0 %362, %v116_v11   ;;  %p403_p3 = por %p402_p2, %p401_p1 }
  0x17   :  { %p404_p4 = pnand %p403_p3, %p397_p0 }
  0x19   :  { %137 = vperm.xlu1 %363, %v119_v12   ;;  %132 = vperm.xlu0 %362, %v118_v13  }
  0x1d   :  { %269 = vperm.xlu1 %363, %v259_v14   ;;  %264 = vperm.xlu0 %362, %v258_v15  }
  0x21   :  { %279 = vperm.xlu1 %363, %v261_v16   ;;  %274 = vperm.xlu0 %362, %v260_v17  }
  0x25   :  { %298 = vperm.xlu0 %362, %v295_v18  }
  0x84   :  { %v71_v22 = vpop.permute.xlu1 %70  ;;  %v37_v23 = vpop.permute.xlu0 %36 }
  0x85   :  { %v60_v24 = vmul.f32 %v321_v21, %v37_v23 }
  0x87   :  { %v88_v25 = vadd.f32 %v71_v22, %v60_v24 }
  0x88   :  { %v76_v26 = vpop.permute.xlu1 %75  ;;  %v42_v27 = vpop.permute.xlu0 %41 }
  0x89   :  { %v92_v28 = vsub.f32 0.0, %v88_v25  ;;  %v61_v29 = vmul.f32 %v321_v21, %v42_v27 }
  0x8b   :  { %v96_v30 = vmul.f32 1.442695, %v92_v28  ;;  %v89_v31 = vadd.f32 %v76_v26, %v61_v29 }
  0x8c   :  { %v52_v32 = vpop.permute.xlu1 %51  ;;  %v47_v33 = vpop.permute.xlu0 %46 }
  0x8d   :  { %364 = vpow2.f32 %v96_v30  ;;  %v93_v34 = vsub.f32 0.0, %v89_v31  ;;  %v63_v36 = vmul.f32 %v321_v21, %v52_v32  ;;  %v62_v37 = vmul.f32 %v321_v21, %v47_v33 }
  0x8f   :  { %v98_v35 = vmul.f32 1.442695, %v93_v34 }
  0x90   :  { %v86_v38 = vpop.permute.xlu1 %85  ;;  %v81_v39 = vpop.permute.xlu0 %80 }
  0x91   :  { %366 = vpow2.f32 %v98_v35  ;;  %v91_v40 = vadd.f32 %v86_v38, %v63_v36  ;;  %v90_v41 = vadd.f32 %v81_v39, %v62_v37 }
  0x93   :  { %v95_v42 = vsub.f32 0.0, %v91_v40  ;;  %v94_v43 = vsub.f32 0.0, %v90_v41  ;;  %v301_v40 = vlaneseq }
  0x94   :  { %v128_v62 = vpop.permute.xlu1 %127  ;;  %v123_v63 = vpop.permute.xlu0 %122 }
  0x95   :  { %v102_v44 = vmul.f32 1.442695, %v95_v42  ;;  %v100_v45 = vmul.f32 1.442695, %v94_v43  ;;  %v302_v43 = vshrl.u32 %v301_v40, 7 }
  0x97   :  { %v365_v46 = vpop.eup %364  ;;  %368 = vpow2.f32 %v102_v44 }
  0x98   :  { %370 = vpow2.f32 %v100_v45  ;;  %v104_v47 = vadd.f32 1.0, %v365_v46  ;;  %v138_v0 = vpop.permute.xlu1 %137  ;;  %v133_v1 = vpop.permute.xlu0 %132  ;;  %v303_v46 = vsub.s32 0, %v302_v43 }
  0x9a   :  { %372 = vrcp.f32 %v104_v47 }
  0x9b   :  { %v367_v48 = vpop.eup %366 }
  0x9c   :  { %v105_v49 = vadd.f32 1.0, %v367_v48  ;;  %v265_v26 = vpop.permute.xlu0 %264  ;;  %v270_v28 = vpop.permute.xlu1 %269 }
  0x9e   :  { %374 = vrcp.f32 %v105_v49 }
  0xa0   :  { %v275_v34 = vpop.permute.xlu0 %274  ;;  %v280_v37 = vpop.permute.xlu1 %279 }
  0xa1   :  { %v369_v50 = vpop.eup %368 }
  0xa2   :  { %v371_v51 = vpop.eup %370  ;;  %v107_v52 = vadd.f32 1.0, %v369_v50 }
  0xa3   :  { %v106_v53 = vadd.f32 1.0, %v371_v51 }
  0xa4   :  { %376 = vrcp.f32 %v107_v52  ;;  %v373_v54 = vpop.eup %372  ;;  %v299_v48 = vpop.permute.xlu0 %298 }
  0xa5   :  { %378 = vrcp.f32 %v106_v53  ;;  %v304_v50 = vrot.slane %v299_v48, %v303_v46 }
  0xa8   :  { %v375_v55 = vpop.eup %374 }
  0xa9   :  { %v348_v56 = vpack.c.bf16 %v375_v55, %v373_v54 }
  0xab   :  { %349 = vmatprep.subr.bf16.mxu0 %v348_v56  ;;  %356 = vmatprep.subr.bf16.mxu1 %v348_v56 }
  0xac   :  { %351 = vmatpush3.bf16.msra.mxu0 %v348_v56  ;;  %358 = vmatpush3.bf16.msra.mxu1 %v348_v56 }
  0xae   :  { %v377_v57 = vpop.eup %376 }
  0xaf   :  { %v379_v58 = vpop.eup %378 }
  0xb0   :  { %v352_v59 = vpack.c.bf16 %v377_v57, %v379_v58 }
  0xb2   :  { %353 = vmatprep.subr.bf16.mxu0 %v352_v59  ;;  %357 = vmatprep.subr.bf16.mxu1 %v352_v59 }
  0xb3   :  { %355 = vmatpush3.bf16.msra.mxu0 %v352_v59  ;;  %359 = vmatpush3.bf16.msra.mxu1 %v352_v59 }
  0xb6   :  { %343 = vmatmul.mubr.msk.f32.vlgmr.msra.gmra.mrb[0].mxu0 %vm140_vm0, %v113_v60  ;;  %346 = vmatmul.mubr.msk.f32.vlgmr.msra.gmra.mrb[0].mxu1 %vm140_vm0, %v115_v61 }
 0x189   :  { %v344_v2 = vpop.f32.mrb[0].mxu0  ;;  %v347_v3 = vpop.f32.mrb[0].mxu1 }
 0x18a   :  { %v225_v4 = vadd.f32 %v344_v2, %v128_v62  ;;  %v235_v5 = vadd.f32 %v347_v3, %v138_v0  ;;  %v219_v6 = vpop.f32.mrb[1].mxu0  ;;  %v229_v7 = vpop.f32.mrb[1].mxu1 }
 0x18b   :  { %v220_v8 = vadd.f32 %v219_v6, %v123_v63  ;;  %v230_v9 = vadd.f32 %v229_v7, %v133_v1 }
 0x18c   :  { %v239_v10 = vsub.f32 0.0, %v225_v4  ;;  %v241_v11 = vsub.f32 0.0, %v235_v5 }
 0x18d   :  { %v238_v12 = vsub.f32 0.0, %v220_v8  ;;  %v240_v13 = vsub.f32 0.0, %v230_v9 }
 0x18e   :  { %v244_v14 = vmul.f32 1.442695, %v239_v10  ;;  %v248_v15 = vmul.f32 1.442695, %v241_v11 }
 0x18f   :  { %v242_v16 = vmul.f32 1.442695, %v238_v12  ;;  %v246_v17 = vmul.f32 1.442695, %v240_v13 }
 0x190   :  { %380 = vpow2.f32 %v244_v14 }
 0x191   :  { %382 = vpow2.f32 %v248_v15 }
 0x192   :  { %384 = vpow2.f32 %v242_v16 }
 0x193   :  { %386 = vpow2.f32 %v246_v17 }
 0x19a   :  { %v381_v18 = vpop.eup %380 }
 0x19b   :  { %v383_v19 = vpop.eup %382  ;;  %v251_v20 = vadd.f32 1.0, %v381_v18 }
 0x19c   :  { %v385_v21 = vpop.eup %384  ;;  %v253_v23 = vadd.f32 1.0, %v383_v19 }
 0x19d   :  { %v387_v22 = vpop.eup %386  ;;  %388 = vrcp.f32 %v251_v20  ;;  %v250_v24 = vadd.f32 1.0, %v385_v21 }
 0x19e   :  { %v252_v25 = vadd.f32 1.0, %v387_v22 }
 0x19f   :  { %390 = vrcp.f32 %v250_v24 }
 0x1a0   :  { %392 = vrcp.f32 %v252_v25 }
 0x1a1   :  { %394 = vrcp.f32 %v253_v23 }
 0x1a7   :  { %v389_v27 = vpop.eup %388 }
 0x1a8   :  { %v283_v29 = vmul.f32 %v389_v27, %v270_v28 }
 0x1a9   :  { %v391_v30 = vpop.eup %390 }
 0x1aa   :  { %v393_v31 = vpop.eup %392  ;;  %v282_v32 = vmul.f32 %v391_v30, %v265_v26 }
 0x1ab   :  { %v395_v33 = vpop.eup %394  ;;  %v284_v35 = vmul.f32 %v393_v31, %v275_v34 }
 0x1ac   :  { %v286_v36 = vadd.f32 %v283_v29, %v282_v32  ;;  %v285_v38 = vmul.f32 %v395_v33, %v280_v37 }
 0x1ae   :  { %v287_v39 = vadd.f32 %v286_v36, %v284_v35 }
 0x1b0   :  { %v288_v41 = vadd.f32 %v287_v39, %v285_v38 }
 0x1b2   :  { %v289_v42 = vrot.slane %v288_v41, 4 }
 0x1b4   :  { %v290_v44 = vadd.f32 %v289_v42, %v288_v41 }
 0x1b6   :  { %v291_v45 = vrot.slane %v290_v44, 2 }
 0x1b8   :  { %v292_v47 = vadd.f32 %v291_v45, %v290_v44 }
 0x1ba   :  { %v293_v49 = vrot.slane %v292_v47, 1 }
 0x1bc   :  { %v294_v51 = vadd.f32 %v293_v49, %v292_v47 }
 0x1be   :  { %v305_v52 = vadd.f32 %v304_v50, %v294_v51 }
 0x1c0   :  { %306 = vst [vmem:[#allocation3] sm:$0x1] %v305_v52 }
 0x1c1   :  { %407 = shalt.err (!%p404_p4)
}
 0x1c2   :  { %s408_s20 = scalar_lea.hbm %s551_s7, 16 }
 0x1c3   :  { %p409_p5 = scmp.ne.s32.totalorder %s551_s7, %s408_s20  ;;  %p412_p6 = scmp.lt.u32.totalorder %s408_s20, %s551_s7 }
 0x1c5   :  { %p414_p7 = pnand %p412_p6, %p409_p5 }
 0x1c7   :  { %417 = shalt.err (!%p414_p7)
}
 0x1c8   :  { %316 = dma.vmem_to_hbm [thread:$0]  %s314_s15, 16, %s551_s7, [#allocation4]  }
 0x1c9   :  { %418 = dma.done.wait [#allocation4], 16  }
 0x1ca   :  { %419 = vsyncadd [#allocation4], 4294967280 }
 0x1cb   :  { %320 = vsyncpa [#allocation4], 1 }

</bundles_post_ra>
